<compile_context>
chip_gen: v7x
topology: tpu7x:2x2x1
jax: 0.10.0
libtpu: 0.0.40
codegen_flags: <defaults>
</compile_context>

<pallas_src>
import jax
import jax.numpy as jnp
from jax import lax
from jax.experimental import pallas as pl
from jax.experimental.pallas import tpu as pltpu

IC = 196        # Ic_global
H = 6           # hidden width of each per-step MLP
LANES = 128     # vreg lane width
ROW_CHUNK = 8   # vreg sublane width -> one full (8,128) vreg per operand
UNROLL = 3      # 195 ReLU steps = 65 * 3


def _cdiv(a, b):
    return -(-a // b)


def _round_up(a, b):
    return _cdiv(a, b) * b


def _rnn_kernel(w1x_ref, w1y_ref, b1_ref, w2_ref, b2_ref, x_ref, o_ref):
    """x_ref: (IC, R_TILE, 128) VMEM block.  o_ref: (R_TILE, 128)."""
    r_tile = x_ref.shape[1]

    def cell(i, xi, y):
        # relu(W1 @ [xi, y] + b1) -> W2 @ h + b2, scalar-broadcast on the VPU.
        terms = []
        for j in range(H):                       # statically unrolled (H = 6)
            k = i * H + j
            u = w1x_ref[k] * xi + b1_ref[k]      # y-independent: can issue early
            h = jnp.maximum(u + w1y_ref[k] * y, 0.0)
            terms.append(w2_ref[k] * h)
        # balanced tree-sum keeps the dependent chain short
        s01 = terms[0] + terms[1]
        s23 = terms[2] + terms[3]
        s45 = (terms[4] + terms[5]) + b2_ref[i]
        return (s01 + s23) + s45

    n_outer = (IC - 1) // UNROLL                 # 65 * 3 = 195 ReLU steps

    # Independent full-vreg (8, 128) row chunks: bounds register pressure while
    # the surrounding block stays large (DMA / grid overhead amortized).
    for c in range(r_tile // ROW_CHUNK):
        r0 = c * ROW_CHUNK
        xc = x_ref.at[:, r0:r0 + ROW_CHUNK, :]   # static view: (IC, 8, 128)
        y0 = xc[0]                               # initial state y = x[..., 0]

        def body(t, y, xc=xc):
            i0 = t * UNROLL
            for u in range(UNROLL):              # partial unroll of the recurrence
                i = i0 + u
                y = jnp.maximum(cell(i, xc[i], y), 0.0)
            return y

        y = lax.fori_loop(0, n_outer, body, y0)

        # final step (i = IC - 1): Sigmoid instead of ReLU
        z = cell(IC - 1, xc[IC - 1], y)
        o_ref[r0:r0 + ROW_CHUNK, :] = jax.nn.sigmoid(z)


@jax.jit
def rnn_forward(x, w1x, w1y, b1, w2, b2):
    """x: (B, S, IC) or (S, IC) float32 -> (B, S, 1) or (S, 1)."""
    squeeze = (x.ndim == 2)
    if squeeze:
        x = x[None]
    B, S, F = x.shape
    assert F == IC
    N = B * S

    # Lane/sublane-dense, feature-major layout: (IC, n_rows, 128).
    # TODO(synk): this transpose is an extra XLA pass over x in HBM; produce x
    # feature-major upstream if the wrapper ever dominates end-to-end time.
    n_rows = _round_up(_cdiv(N, LANES), ROW_CHUNK)
    # Largest block (<= 32 rows ~= 3.2 MiB of x) that divides n_rows: no extra
    # padding, and large N still yields plenty of grid tiles for megacore.
    r_tile = ROW_CHUNK
    for cand in (32, 24, 16):
        if n_rows % cand == 0:
            r_tile = cand
            break

    xt = x.reshape(N, IC).T.astype(jnp.float32)            # (IC, N)
    xt = jnp.pad(xt, ((0, 0), (0, n_rows * LANES - N)))
    xt = xt.reshape(IC, n_rows, LANES)

    smem = pl.BlockSpec(memory_space=pltpu.MemorySpace.SMEM)
    out = pl.pallas_call(
        _rnn_kernel,
        out_shape=jax.ShapeDtypeStruct((n_rows, LANES), jnp.float32),
        grid_spec=pltpu.PrefetchScalarGridSpec(
            num_scalar_prefetch=0,
            grid=(n_rows // r_tile,),
            in_specs=[smem, smem, smem, smem, smem,
                      pl.BlockSpec((IC, r_tile, LANES), lambda n: (0, n, 0))],
            out_specs=pl.BlockSpec((r_tile, LANES), lambda n: (n, 0)),
        ),
        compiler_params=pltpu.CompilerParams(
            dimension_semantics=("parallel",)),
    )(w1x, w1y, b1, w2, b2, xt)

    y = out.reshape(-1)[:N].reshape(B, S, 1)
    if squeeze:
        y = y[0]
    return y


def init_params(key):
    """Deterministic init mimicking nn.Linear's uniform(-1/sqrt(fan_in), ...)."""
    k1, k2, k3, k4 = jax.random.split(key, 4)
    bnd1 = 1.0 / jnp.sqrt(2.0)
    bnd2 = 1.0 / jnp.sqrt(6.0)
    W1 = jax.random.uniform(k1, (IC, H, 2), jnp.float32, -bnd1, bnd1)
    B1 = jax.random.uniform(k2, (IC, H), jnp.float32, -bnd1, bnd1)
    W2 = jax.random.uniform(k3, (IC, 1, H), jnp.float32, -bnd2, bnd2)
    B2 = jax.random.uniform(k4, (IC, 1), jnp.float32, -bnd2, bnd2)
    # flat layouts for the kernel's SMEM scalar reads
    w1x = W1[:, :, 0].reshape(-1)   # (IC*H,) weight applied to x_i
    w1y = W1[:, :, 1].reshape(-1)   # (IC*H,) weight applied to carried y
    b1 = B1.reshape(-1)             # (IC*H,)
    w2 = W2.reshape(-1)             # (IC*H,)
    b2 = B2.reshape(-1)             # (IC,)
    return (W1, B1, W2, B2), (w1x, w1y, b1, w2, b2)


def reference(x, W1, B1, W2, B2):
    """Pure-JAX reproduction of the PyTorch forward (for verification)."""
    squeeze = (x.ndim == 2)
    if squeeze:
        x = x[None]
    y = x[..., 0:1]
    for i in range(IC):
        inp = jnp.concatenate([x[..., i:i + 1], y], axis=-1)        # (B,S,2)
        h = jnp.maximum(inp @ W1[i].T + B1[i], 0.0)                 # (B,S,6)
        z = h @ W2[i].T + B2[i]                                     # (B,S,1)
        y = jax.nn.sigmoid(z) if i == IC - 1 else jnp.maximum(z, 0.0)
    return y[0] if squeeze else y


if __name__ == "__main__":
    key = jax.random.PRNGKey(0)
    kx, kp = jax.random.split(key)

    B, S = 2, 8
    x = jax.random.normal(kx, (B, S, IC), dtype=jnp.float32)

    (W1, B1, W2, B2), flat = init_params(kp)

    y = rnn_forward(x, *flat)
    y = jax.block_until_ready(y)

    y_ref = reference(x, W1, B1, W2, B2)
    assert y.shape == (B, S, 1), y.shape
    assert jnp.allclose(y, y_ref, atol=1e-5, rtol=1e-5), (
        float(jnp.max(jnp.abs(y - y_ref))))

    # also exercise the 2-D input path (the module's `flag` branch)
    y2 = jax.block_until_ready(rnn_forward(x[0], *flat))
    assert y2.shape == (S, 1)
    assert jnp.allclose(y2, y[0], atol=1e-5, rtol=1e-5)

    print("KERNEL_OK")
</pallas_src>

<mosaic_0001>
module attributes {stable_mosaic.version = 11 : i64} {
  func.func @_rnn_kernel(%arg0: i32, %arg1: memref<1176xf32, #tpu.memory_space<smem>>, %arg2: memref<1176xf32, #tpu.memory_space<smem>>, %arg3: memref<1176xf32, #tpu.memory_space<smem>>, %arg4: memref<1176xf32, #tpu.memory_space<smem>>, %arg5: memref<196xf32, #tpu.memory_space<smem>>, %arg6: memref<196x8x128xf32, #tpu.memory_space<vmem>>, %arg7: memref<8x128xf32, #tpu.memory_space<vmem>>) attributes {dimension_semantics = [#tpu.dimension_semantics<parallel>], iteration_bounds = array<i64: 1>, scalar_prefetch = 0 : i64, scratch_operands = 0 : i64, tpu.core_type = #tpu.core_type<tc>, window_params = [{transform_indices = @transform_0, window_bounds = array<i64: 1176>}, {transform_indices = @transform_1, window_bounds = array<i64: 1176>}, {transform_indices = @transform_2, window_bounds = array<i64: 1176>}, {transform_indices = @transform_3, window_bounds = array<i64: 1176>}, {transform_indices = @transform_4, window_bounds = array<i64: 196>}, {transform_indices = @transform_5, window_bounds = array<i64: 196, 8, 128>}, {transform_indices = @transform_6, window_bounds = array<i64: 8, 128>}]} {
    %c0_i32 = arith.constant 0 : i32
    %c0_i32_0 = arith.constant 0 : i32
    %c0_i32_1 = arith.constant 0 : i32
    %0 = tpu.memref_slice %arg6[%c0_i32, %c0_i32_0, %c0_i32_1] : memref<196x8x128xf32, #tpu.memory_space<vmem>> -> memref<196x8x128xf32, #tpu.memory_space<vmem>>
    %c0 = arith.constant 0 : index
    %c0_2 = arith.constant 0 : index
    %c0_3 = arith.constant 0 : index
    %1 = vector.load %0[%c0, %c0_2, %c0_3] : memref<196x8x128xf32, #tpu.memory_space<vmem>>, vector<1x8x128xf32>
    %2 = vector.shape_cast %1 : vector<1x8x128xf32> to vector<8x128xf32>
    %c0_i32_4 = arith.constant 0 : i32
    %c65_i32 = arith.constant 65 : i32
    %3 = arith.addi %c0_i32_4, %c65_i32 : i32
    %c1_i32 = arith.constant 1 : i32
    %4 = scf.for %arg8 = %c0_i32_4 to %3 step %c1_i32 iter_args(%arg9 = %2) -> (vector<8x128xf32>)  : i32 {
      %c3_i32 = arith.constant 3 : i32
      %112 = arith.muli %arg8, %c3_i32 : i32
      %c0_i32_38 = arith.constant 0 : i32
      %113 = arith.addi %112, %c0_i32_38 : i32
      %c0_i32_39 = arith.constant 0 : i32
      %c0_i32_40 = arith.constant 0 : i32
      %c0_i32_41 = arith.constant 0 : i32
      %114 = tpu.memref_slice %arg6[%c0_i32_39, %c0_i32_40, %c0_i32_41] : memref<196x8x128xf32, #tpu.memory_space<vmem>> -> memref<196x8x128xf32, #tpu.memory_space<vmem>>
      %115 = arith.index_cast %113 : i32 to index
      %c0_42 = arith.constant 0 : index
      %c0_43 = arith.constant 0 : index
      %116 = vector.load %114[%115, %c0_42, %c0_43] : memref<196x8x128xf32, #tpu.memory_space<vmem>>, vector<1x8x128xf32>
      %117 = vector.shape_cast %116 : vector<1x8x128xf32> to vector<8x128xf32>
      %c6_i32 = arith.constant 6 : i32
      %118 = arith.muli %113, %c6_i32 : i32
      %c0_i32_44 = arith.constant 0 : i32
      %119 = arith.addi %118, %c0_i32_44 : i32
      %120 = arith.index_cast %119 : i32 to index
      %121 = memref.load %arg1[%120] : memref<1176xf32, #tpu.memory_space<smem>>
      %122 = vector.broadcast %121 : f32 to vector<8x128xf32>
      %123 = arith.mulf %122, %117 : vector<8x128xf32>
      %124 = arith.index_cast %119 : i32 to index
      %125 = memref.load %arg3[%124] : memref<1176xf32, #tpu.memory_space<smem>>
      %126 = vector.broadcast %125 : f32 to vector<8x128xf32>
      %127 = arith.addf %123, %126 : vector<8x128xf32>
      %128 = arith.index_cast %119 : i32 to index
      %129 = memref.load %arg2[%128] : memref<1176xf32, #tpu.memory_space<smem>>
      %130 = vector.broadcast %129 : f32 to vector<8x128xf32>
      %131 = arith.mulf %130, %arg9 : vector<8x128xf32>
      %132 = arith.addf %127, %131 : vector<8x128xf32>
      %cst_45 = arith.constant 0.000000e+00 : f32
      %133 = vector.broadcast %cst_45 : f32 to vector<8x128xf32>
      %134 = arith.maximumf %132, %133 : vector<8x128xf32>
      %135 = arith.index_cast %119 : i32 to index
      %136 = memref.load %arg4[%135] : memref<1176xf32, #tpu.memory_space<smem>>
      %137 = vector.broadcast %136 : f32 to vector<8x128xf32>
      %138 = arith.mulf %137, %134 : vector<8x128xf32>
      %c6_i32_46 = arith.constant 6 : i32
      %139 = arith.muli %113, %c6_i32_46 : i32
      %c1_i32_47 = arith.constant 1 : i32
      %140 = arith.addi %139, %c1_i32_47 : i32
      %141 = arith.index_cast %140 : i32 to index
      %142 = memref.load %arg1[%141] : memref<1176xf32, #tpu.memory_space<smem>>
      %143 = vector.broadcast %142 : f32 to vector<8x128xf32>
      %144 = arith.mulf %143, %117 : vector<8x128xf32>
      %145 = arith.index_cast %140 : i32 to index
      %146 = memref.load %arg3[%145] : memref<1176xf32, #tpu.memory_space<smem>>
      %147 = vector.broadcast %146 : f32 to vector<8x128xf32>
      %148 = arith.addf %144, %147 : vector<8x128xf32>
      %149 = arith.index_cast %140 : i32 to index
      %150 = memref.load %arg2[%149] : memref<1176xf32, #tpu.memory_space<smem>>
      %151 = vector.broadcast %150 : f32 to vector<8x128xf32>
      %152 = arith.mulf %151, %arg9 : vector<8x128xf32>
      %153 = arith.addf %148, %152 : vector<8x128xf32>
      %cst_48 = arith.constant 0.000000e+00 : f32
      %154 = vector.broadcast %cst_48 : f32 to vector<8x128xf32>
      %155 = arith.maximumf %153, %154 : vector<8x128xf32>
      %156 = arith.index_cast %140 : i32 to index
      %157 = memref.load %arg4[%156] : memref<1176xf32, #tpu.memory_space<smem>>
      %158 = vector.broadcast %157 : f32 to vector<8x128xf32>
      %159 = arith.mulf %158, %155 : vector<8x128xf32>
      %c6_i32_49 = arith.constant 6 : i32
      %160 = arith.muli %113, %c6_i32_49 : i32
      %c2_i32 = arith.constant 2 : i32
      %161 = arith.addi %160, %c2_i32 : i32
      %162 = arith.index_cast %161 : i32 to index
      %163 = memref.load %arg1[%162] : memref<1176xf32, #tpu.memory_space<smem>>
      %164 = vector.broadcast %163 : f32 to vector<8x128xf32>
      %165 = arith.mulf %164, %117 : vector<8x128xf32>
      %166 = arith.index_cast %161 : i32 to index
      %167 = memref.load %arg3[%166] : memref<1176xf32, #tpu.memory_space<smem>>
      %168 = vector.broadcast %167 : f32 to vector<8x128xf32>
      %169 = arith.addf %165, %168 : vector<8x128xf32>
      %170 = arith.index_cast %161 : i32 to index
      %171 = memref.load %arg2[%170] : memref<1176xf32, #tpu.memory_space<smem>>
      %172 = vector.broadcast %171 : f32 to vector<8x128xf32>
      %173 = arith.mulf %172, %arg9 : vector<8x128xf32>
      %174 = arith.addf %169, %173 : vector<8x128xf32>
      %cst_50 = arith.constant 0.000000e+00 : f32
      %175 = vector.broadcast %cst_50 : f32 to vector<8x128xf32>
      %176 = arith.maximumf %174, %175 : vector<8x128xf32>
      %177 = arith.index_cast %161 : i32 to index
      %178 = memref.load %arg4[%177] : memref<1176xf32, #tpu.memory_space<smem>>
      %179 = vector.broadcast %178 : f32 to vector<8x128xf32>
      %180 = arith.mulf %179, %176 : vector<8x128xf32>
      %c6_i32_51 = arith.constant 6 : i32
      %181 = arith.muli %113, %c6_i32_51 : i32
      %c3_i32_52 = arith.constant 3 : i32
      %182 = arith.addi %181, %c3_i32_52 : i32
      %183 = arith.index_cast %182 : i32 to index
      %184 = memref.load %arg1[%183] : memref<1176xf32, #tpu.memory_space<smem>>
      %185 = vector.broadcast %184 : f32 to vector<8x128xf32>
      %186 = arith.mulf %185, %117 : vector<8x128xf32>
      %187 = arith.index_cast %182 : i32 to index
      %188 = memref.load %arg3[%187] : memref<1176xf32, #tpu.memory_space<smem>>
      %189 = vector.broadcast %188 : f32 to vector<8x128xf32>
      %190 = arith.addf %186, %189 : vector<8x128xf32>
      %191 = arith.index_cast %182 : i32 to index
      %192 = memref.load %arg2[%191] : memref<1176xf32, #tpu.memory_space<smem>>
      %193 = vector.broadcast %192 : f32 to vector<8x128xf32>
      %194 = arith.mulf %193, %arg9 : vector<8x128xf32>
      %195 = arith.addf %190, %194 : vector<8x128xf32>
      %cst_53 = arith.constant 0.000000e+00 : f32
      %196 = vector.broadcast %cst_53 : f32 to vector<8x128xf32>
      %197 = arith.maximumf %195, %196 : vector<8x128xf32>
      %198 = arith.index_cast %182 : i32 to index
      %199 = memref.load %arg4[%198] : memref<1176xf32, #tpu.memory_space<smem>>
      %200 = vector.broadcast %199 : f32 to vector<8x128xf32>
      %201 = arith.mulf %200, %197 : vector<8x128xf32>
      %c6_i32_54 = arith.constant 6 : i32
      %202 = arith.muli %113, %c6_i32_54 : i32
      %c4_i32 = arith.constant 4 : i32
      %203 = arith.addi %202, %c4_i32 : i32
      %204 = arith.index_cast %203 : i32 to index
      %205 = memref.load %arg1[%204] : memref<1176xf32, #tpu.memory_space<smem>>
      %206 = vector.broadcast %205 : f32 to vector<8x128xf32>
      %207 = arith.mulf %206, %117 : vector<8x128xf32>
      %208 = arith.index_cast %203 : i32 to index
      %209 = memref.load %arg3[%208] : memref<1176xf32, #tpu.memory_space<smem>>
      %210 = vector.broadcast %209 : f32 to vector<8x128xf32>
      %211 = arith.addf %207, %210 : vector<8x128xf32>
      %212 = arith.index_cast %203 : i32 to index
      %213 = memref.load %arg2[%212] : memref<1176xf32, #tpu.memory_space<smem>>
      %214 = vector.broadcast %213 : f32 to vector<8x128xf32>
      %215 = arith.mulf %214, %arg9 : vector<8x128xf32>
      %216 = arith.addf %211, %215 : vector<8x128xf32>
      %cst_55 = arith.constant 0.000000e+00 : f32
      %217 = vector.broadcast %cst_55 : f32 to vector<8x128xf32>
      %218 = arith.maximumf %216, %217 : vector<8x128xf32>
      %219 = arith.index_cast %203 : i32 to index
      %220 = memref.load %arg4[%219] : memref<1176xf32, #tpu.memory_space<smem>>
      %221 = vector.broadcast %220 : f32 to vector<8x128xf32>
      %222 = arith.mulf %221, %218 : vector<8x128xf32>
      %c6_i32_56 = arith.constant 6 : i32
      %223 = arith.muli %113, %c6_i32_56 : i32
      %c5_i32 = arith.constant 5 : i32
      %224 = arith.addi %223, %c5_i32 : i32
      %225 = arith.index_cast %224 : i32 to index
      %226 = memref.load %arg1[%225] : memref<1176xf32, #tpu.memory_space<smem>>
      %227 = vector.broadcast %226 : f32 to vector<8x128xf32>
      %228 = arith.mulf %227, %117 : vector<8x128xf32>
      %229 = arith.index_cast %224 : i32 to index
      %230 = memref.load %arg3[%229] : memref<1176xf32, #tpu.memory_space<smem>>
      %231 = vector.broadcast %230 : f32 to vector<8x128xf32>
      %232 = arith.addf %228, %231 : vector<8x128xf32>
      %233 = arith.index_cast %224 : i32 to index
      %234 = memref.load %arg2[%233] : memref<1176xf32, #tpu.memory_space<smem>>
      %235 = vector.broadcast %234 : f32 to vector<8x128xf32>
      %236 = arith.mulf %235, %arg9 : vector<8x128xf32>
      %237 = arith.addf %232, %236 : vector<8x128xf32>
      %cst_57 = arith.constant 0.000000e+00 : f32
      %238 = vector.broadcast %cst_57 : f32 to vector<8x128xf32>
      %239 = arith.maximumf %237, %238 : vector<8x128xf32>
      %240 = arith.index_cast %224 : i32 to index
      %241 = memref.load %arg4[%240] : memref<1176xf32, #tpu.memory_space<smem>>
      %242 = vector.broadcast %241 : f32 to vector<8x128xf32>
      %243 = arith.mulf %242, %239 : vector<8x128xf32>
      %244 = arith.addf %138, %159 : vector<8x128xf32>
      %245 = arith.addf %180, %201 : vector<8x128xf32>
      %246 = arith.addf %222, %243 : vector<8x128xf32>
      %247 = arith.index_cast %113 : i32 to index
      %248 = memref.load %arg5[%247] : memref<196xf32, #tpu.memory_space<smem>>
      %249 = vector.broadcast %248 : f32 to vector<8x128xf32>
      %250 = arith.addf %246, %249 : vector<8x128xf32>
      %251 = arith.addf %244, %245 : vector<8x128xf32>
      %252 = arith.addf %251, %250 : vector<8x128xf32>
      %cst_58 = arith.constant 0.000000e+00 : f32
      %253 = vector.broadcast %cst_58 : f32 to vector<8x128xf32>
      %254 = arith.maximumf %252, %253 : vector<8x128xf32>
      %c1_i32_59 = arith.constant 1 : i32
      %255 = arith.addi %112, %c1_i32_59 : i32
      %c0_i32_60 = arith.constant 0 : i32
      %c0_i32_61 = arith.constant 0 : i32
      %c0_i32_62 = arith.constant 0 : i32
      %256 = tpu.memref_slice %arg6[%c0_i32_60, %c0_i32_61, %c0_i32_62] : memref<196x8x128xf32, #tpu.memory_space<vmem>> -> memref<196x8x128xf32, #tpu.memory_space<vmem>>
      %257 = arith.index_cast %255 : i32 to index
      %c0_63 = arith.constant 0 : index
      %c0_64 = arith.constant 0 : index
      %258 = vector.load %256[%257, %c0_63, %c0_64] : memref<196x8x128xf32, #tpu.memory_space<vmem>>, vector<1x8x128xf32>
      %259 = vector.shape_cast %258 : vector<1x8x128xf32> to vector<8x128xf32>
      %c6_i32_65 = arith.constant 6 : i32
      %260 = arith.muli %255, %c6_i32_65 : i32
      %c0_i32_66 = arith.constant 0 : i32
      %261 = arith.addi %260, %c0_i32_66 : i32
      %262 = arith.index_cast %261 : i32 to index
      %263 = memref.load %arg1[%262] : memref<1176xf32, #tpu.memory_space<smem>>
      %264 = vector.broadcast %263 : f32 to vector<8x128xf32>
      %265 = arith.mulf %264, %259 : vector<8x128xf32>
      %266 = arith.index_cast %261 : i32 to index
      %267 = memref.load %arg3[%266] : memref<1176xf32, #tpu.memory_space<smem>>
      %268 = vector.broadcast %267 : f32 to vector<8x128xf32>
      %269 = arith.addf %265, %268 : vector<8x128xf32>
      %270 = arith.index_cast %261 : i32 to index
      %271 = memref.load %arg2[%270] : memref<1176xf32, #tpu.memory_space<smem>>
      %272 = vector.broadcast %271 : f32 to vector<8x128xf32>
      %273 = arith.mulf %272, %254 : vector<8x128xf32>
      %274 = arith.addf %269, %273 : vector<8x128xf32>
      %cst_67 = arith.constant 0.000000e+00 : f32
      %275 = vector.broadcast %cst_67 : f32 to vector<8x128xf32>
      %276 = arith.maximumf %274, %275 : vector<8x128xf32>
      %277 = arith.index_cast %261 : i32 to index
      %278 = memref.load %arg4[%277] : memref<1176xf32, #tpu.memory_space<smem>>
      %279 = vector.broadcast %278 : f32 to vector<8x128xf32>
      %280 = arith.mulf %279, %276 : vector<8x128xf32>
      %c6_i32_68 = arith.constant 6 : i32
      %281 = arith.muli %255, %c6_i32_68 : i32
      %c1_i32_69 = arith.constant 1 : i32
      %282 = arith.addi %281, %c1_i32_69 : i32
      %283 = arith.index_cast %282 : i32 to index
      %284 = memref.load %arg1[%283] : memref<1176xf32, #tpu.memory_space<smem>>
      %285 = vector.broadcast %284 : f32 to vector<8x128xf32>
      %286 = arith.mulf %285, %259 : vector<8x128xf32>
      %287 = arith.index_cast %282 : i32 to index
      %288 = memref.load %arg3[%287] : memref<1176xf32, #tpu.memory_space<smem>>
      %289 = vector.broadcast %288 : f32 to vector<8x128xf32>
      %290 = arith.addf %286, %289 : vector<8x128xf32>
      %291 = arith.index_cast %282 : i32 to index
      %292 = memref.load %arg2[%291] : memref<1176xf32, #tpu.memory_space<smem>>
      %293 = vector.broadcast %292 : f32 to vector<8x128xf32>
      %294 = arith.mulf %293, %254 : vector<8x128xf32>
      %295 = arith.addf %290, %294 : vector<8x128xf32>
      %cst_70 = arith.constant 0.000000e+00 : f32
      %296 = vector.broadcast %cst_70 : f32 to vector<8x128xf32>
      %297 = arith.maximumf %295, %296 : vector<8x128xf32>
      %298 = arith.index_cast %282 : i32 to index
      %299 = memref.load %arg4[%298] : memref<1176xf32, #tpu.memory_space<smem>>
      %300 = vector.broadcast %299 : f32 to vector<8x128xf32>
      %301 = arith.mulf %300, %297 : vector<8x128xf32>
      %c6_i32_71 = arith.constant 6 : i32
      %302 = arith.muli %255, %c6_i32_71 : i32
      %c2_i32_72 = arith.constant 2 : i32
      %303 = arith.addi %302, %c2_i32_72 : i32
      %304 = arith.index_cast %303 : i32 to index
      %305 = memref.load %arg1[%304] : memref<1176xf32, #tpu.memory_space<smem>>
      %306 = vector.broadcast %305 : f32 to vector<8x128xf32>
      %307 = arith.mulf %306, %259 : vector<8x128xf32>
      %308 = arith.index_cast %303 : i32 to index
      %309 = memref.load %arg3[%308] : memref<1176xf32, #tpu.memory_space<smem>>
      %310 = vector.broadcast %309 : f32 to vector<8x128xf32>
      %311 = arith.addf %307, %310 : vector<8x128xf32>
      %312 = arith.index_cast %303 : i32 to index
      %313 = memref.load %arg2[%312] : memref<1176xf32, #tpu.memory_space<smem>>
      %314 = vector.broadcast %313 : f32 to vector<8x128xf32>
      %315 = arith.mulf %314, %254 : vector<8x128xf32>
      %316 = arith.addf %311, %315 : vector<8x128xf32>
      %cst_73 = arith.constant 0.000000e+00 : f32
      %317 = vector.broadcast %cst_73 : f32 to vector<8x128xf32>
      %318 = arith.maximumf %316, %317 : vector<8x128xf32>
      %319 = arith.index_cast %303 : i32 to index
      %320 = memref.load %arg4[%319] : memref<1176xf32, #tpu.memory_space<smem>>
      %321 = vector.broadcast %320 : f32 to vector<8x128xf32>
      %322 = arith.mulf %321, %318 : vector<8x128xf32>
      %c6_i32_74 = arith.constant 6 : i32
      %323 = arith.muli %255, %c6_i32_74 : i32
      %c3_i32_75 = arith.constant 3 : i32
      %324 = arith.addi %323, %c3_i32_75 : i32
      %325 = arith.index_cast %324 : i32 to index
      %326 = memref.load %arg1[%325] : memref<1176xf32, #tpu.memory_space<smem>>
      %327 = vector.broadcast %326 : f32 to vector<8x128xf32>
      %328 = arith.mulf %327, %259 : vector<8x128xf32>
      %329 = arith.index_cast %324 : i32 to index
      %330 = memref.load %arg3[%329] : memref<1176xf32, #tpu.memory_space<smem>>
      %331 = vector.broadcast %330 : f32 to vector<8x128xf32>
      %332 = arith.addf %328, %331 : vector<8x128xf32>
      %333 = arith.index_cast %324 : i32 to index
      %334 = memref.load %arg2[%333] : memref<1176xf32, #tpu.memory_space<smem>>
      %335 = vector.broadcast %334 : f32 to vector<8x128xf32>
      %336 = arith.mulf %335, %254 : vector<8x128xf32>
      %337 = arith.addf %332, %336 : vector<8x128xf32>
      %cst_76 = arith.constant 0.000000e+00 : f32
      %338 = vector.broadcast %cst_76 : f32 to vector<8x128xf32>
      %339 = arith.maximumf %337, %338 : vector<8x128xf32>
      %340 = arith.index_cast %324 : i32 to index
      %341 = memref.load %arg4[%340] : memref<1176xf32, #tpu.memory_space<smem>>
      %342 = vector.broadcast %341 : f32 to vector<8x128xf32>
      %343 = arith.mulf %342, %339 : vector<8x128xf32>
      %c6_i32_77 = arith.constant 6 : i32
      %344 = arith.muli %255, %c6_i32_77 : i32
      %c4_i32_78 = arith.constant 4 : i32
      %345 = arith.addi %344, %c4_i32_78 : i32
      %346 = arith.index_cast %345 : i32 to index
      %347 = memref.load %arg1[%346] : memref<1176xf32, #tpu.memory_space<smem>>
      %348 = vector.broadcast %347 : f32 to vector<8x128xf32>
      %349 = arith.mulf %348, %259 : vector<8x128xf32>
      %350 = arith.index_cast %345 : i32 to index
      %351 = memref.load %arg3[%350] : memref<1176xf32, #tpu.memory_space<smem>>
      %352 = vector.broadcast %351 : f32 to vector<8x128xf32>
      %353 = arith.addf %349, %352 : vector<8x128xf32>
      %354 = arith.index_cast %345 : i32 to index
      %355 = memref.load %arg2[%354] : memref<1176xf32, #tpu.memory_space<smem>>
      %356 = vector.broadcast %355 : f32 to vector<8x128xf32>
      %357 = arith.mulf %356, %254 : vector<8x128xf32>
      %358 = arith.addf %353, %357 : vector<8x128xf32>
      %cst_79 = arith.constant 0.000000e+00 : f32
      %359 = vector.broadcast %cst_79 : f32 to vector<8x128xf32>
      %360 = arith.maximumf %358, %359 : vector<8x128xf32>
      %361 = arith.index_cast %345 : i32 to index
      %362 = memref.load %arg4[%361] : memref<1176xf32, #tpu.memory_space<smem>>
      %363 = vector.broadcast %362 : f32 to vector<8x128xf32>
      %364 = arith.mulf %363, %360 : vector<8x128xf32>
      %c6_i32_80 = arith.constant 6 : i32
      %365 = arith.muli %255, %c6_i32_80 : i32
      %c5_i32_81 = arith.constant 5 : i32
      %366 = arith.addi %365, %c5_i32_81 : i32
      %367 = arith.index_cast %366 : i32 to index
      %368 = memref.load %arg1[%367] : memref<1176xf32, #tpu.memory_space<smem>>
      %369 = vector.broadcast %368 : f32 to vector<8x128xf32>
      %370 = arith.mulf %369, %259 : vector<8x128xf32>
      %371 = arith.index_cast %366 : i32 to index
      %372 = memref.load %arg3[%371] : memref<1176xf32, #tpu.memory_space<smem>>
      %373 = vector.broadcast %372 : f32 to vector<8x128xf32>
      %374 = arith.addf %370, %373 : vector<8x128xf32>
      %375 = arith.index_cast %366 : i32 to index
      %376 = memref.load %arg2[%375] : memref<1176xf32, #tpu.memory_space<smem>>
      %377 = vector.broadcast %376 : f32 to vector<8x128xf32>
      %378 = arith.mulf %377, %254 : vector<8x128xf32>
      %379 = arith.addf %374, %378 : vector<8x128xf32>
      %cst_82 = arith.constant 0.000000e+00 : f32
      %380 = vector.broadcast %cst_82 : f32 to vector<8x128xf32>
      %381 = arith.maximumf %379, %380 : vector<8x128xf32>
      %382 = arith.index_cast %366 : i32 to index
      %383 = memref.load %arg4[%382] : memref<1176xf32, #tpu.memory_space<smem>>
      %384 = vector.broadcast %383 : f32 to vector<8x128xf32>
      %385 = arith.mulf %384, %381 : vector<8x128xf32>
      %386 = arith.addf %280, %301 : vector<8x128xf32>
      %387 = arith.addf %322, %343 : vector<8x128xf32>
      %388 = arith.addf %364, %385 : vector<8x128xf32>
      %389 = arith.index_cast %255 : i32 to index
      %390 = memref.load %arg5[%389] : memref<196xf32, #tpu.memory_space<smem>>
      %391 = vector.broadcast %390 : f32 to vector<8x128xf32>
      %392 = arith.addf %388, %391 : vector<8x128xf32>
      %393 = arith.addf %386, %387 : vector<8x128xf32>
      %394 = arith.addf %393, %392 : vector<8x128xf32>
      %cst_83 = arith.constant 0.000000e+00 : f32
      %395 = vector.broadcast %cst_83 : f32 to vector<8x128xf32>
      %396 = arith.maximumf %394, %395 : vector<8x128xf32>
      %c2_i32_84 = arith.constant 2 : i32
      %397 = arith.addi %112, %c2_i32_84 : i32
      %c0_i32_85 = arith.constant 0 : i32
      %c0_i32_86 = arith.constant 0 : i32
      %c0_i32_87 = arith.constant 0 : i32
      %398 = tpu.memref_slice %arg6[%c0_i32_85, %c0_i32_86, %c0_i32_87] : memref<196x8x128xf32, #tpu.memory_space<vmem>> -> memref<196x8x128xf32, #tpu.memory_space<vmem>>
      %399 = arith.index_cast %397 : i32 to index
      %c0_88 = arith.constant 0 : index
      %c0_89 = arith.constant 0 : index
      %400 = vector.load %398[%399, %c0_88, %c0_89] : memref<196x8x128xf32, #tpu.memory_space<vmem>>, vector<1x8x128xf32>
      %401 = vector.shape_cast %400 : vector<1x8x128xf32> to vector<8x128xf32>
      %c6_i32_90 = arith.constant 6 : i32
      %402 = arith.muli %397, %c6_i32_90 : i32
      %c0_i32_91 = arith.constant 0 : i32
      %403 = arith.addi %402, %c0_i32_91 : i32
      %404 = arith.index_cast %403 : i32 to index
      %405 = memref.load %arg1[%404] : memref<1176xf32, #tpu.memory_space<smem>>
      %406 = vector.broadcast %405 : f32 to vector<8x128xf32>
      %407 = arith.mulf %406, %401 : vector<8x128xf32>
      %408 = arith.index_cast %403 : i32 to index
      %409 = memref.load %arg3[%408] : memref<1176xf32, #tpu.memory_space<smem>>
      %410 = vector.broadcast %409 : f32 to vector<8x128xf32>
      %411 = arith.addf %407, %410 : vector<8x128xf32>
      %412 = arith.index_cast %403 : i32 to index
      %413 = memref.load %arg2[%412] : memref<1176xf32, #tpu.memory_space<smem>>
      %414 = vector.broadcast %413 : f32 to vector<8x128xf32>
      %415 = arith.mulf %414, %396 : vector<8x128xf32>
      %416 = arith.addf %411, %415 : vector<8x128xf32>
      %cst_92 = arith.constant 0.000000e+00 : f32
      %417 = vector.broadcast %cst_92 : f32 to vector<8x128xf32>
      %418 = arith.maximumf %416, %417 : vector<8x128xf32>
      %419 = arith.index_cast %403 : i32 to index
      %420 = memref.load %arg4[%419] : memref<1176xf32, #tpu.memory_space<smem>>
      %421 = vector.broadcast %420 : f32 to vector<8x128xf32>
      %422 = arith.mulf %421, %418 : vector<8x128xf32>
      %c6_i32_93 = arith.constant 6 : i32
      %423 = arith.muli %397, %c6_i32_93 : i32
      %c1_i32_94 = arith.constant 1 : i32
      %424 = arith.addi %423, %c1_i32_94 : i32
      %425 = arith.index_cast %424 : i32 to index
      %426 = memref.load %arg1[%425] : memref<1176xf32, #tpu.memory_space<smem>>
      %427 = vector.broadcast %426 : f32 to vector<8x128xf32>
      %428 = arith.mulf %427, %401 : vector<8x128xf32>
      %429 = arith.index_cast %424 : i32 to index
      %430 = memref.load %arg3[%429] : memref<1176xf32, #tpu.memory_space<smem>>
      %431 = vector.broadcast %430 : f32 to vector<8x128xf32>
      %432 = arith.addf %428, %431 : vector<8x128xf32>
      %433 = arith.index_cast %424 : i32 to index
      %434 = memref.load %arg2[%433] : memref<1176xf32, #tpu.memory_space<smem>>
      %435 = vector.broadcast %434 : f32 to vector<8x128xf32>
      %436 = arith.mulf %435, %396 : vector<8x128xf32>
      %437 = arith.addf %432, %436 : vector<8x128xf32>
      %cst_95 = arith.constant 0.000000e+00 : f32
      %438 = vector.broadcast %cst_95 : f32 to vector<8x128xf32>
      %439 = arith.maximumf %437, %438 : vector<8x128xf32>
      %440 = arith.index_cast %424 : i32 to index
      %441 = memref.load %arg4[%440] : memref<1176xf32, #tpu.memory_space<smem>>
      %442 = vector.broadcast %441 : f32 to vector<8x128xf32>
      %443 = arith.mulf %442, %439 : vector<8x128xf32>
      %c6_i32_96 = arith.constant 6 : i32
      %444 = arith.muli %397, %c6_i32_96 : i32
      %c2_i32_97 = arith.constant 2 : i32
      %445 = arith.addi %444, %c2_i32_97 : i32
      %446 = arith.index_cast %445 : i32 to index
      %447 = memref.load %arg1[%446] : memref<1176xf32, #tpu.memory_space<smem>>
      %448 = vector.broadcast %447 : f32 to vector<8x128xf32>
      %449 = arith.mulf %448, %401 : vector<8x128xf32>
      %450 = arith.index_cast %445 : i32 to index
      %451 = memref.load %arg3[%450] : memref<1176xf32, #tpu.memory_space<smem>>
      %452 = vector.broadcast %451 : f32 to vector<8x128xf32>
      %453 = arith.addf %449, %452 : vector<8x128xf32>
      %454 = arith.index_cast %445 : i32 to index
      %455 = memref.load %arg2[%454] : memref<1176xf32, #tpu.memory_space<smem>>
      %456 = vector.broadcast %455 : f32 to vector<8x128xf32>
      %457 = arith.mulf %456, %396 : vector<8x128xf32>
      %458 = arith.addf %453, %457 : vector<8x128xf32>
      %cst_98 = arith.constant 0.000000e+00 : f32
      %459 = vector.broadcast %cst_98 : f32 to vector<8x128xf32>
      %460 = arith.maximumf %458, %459 : vector<8x128xf32>
      %461 = arith.index_cast %445 : i32 to index
      %462 = memref.load %arg4[%461] : memref<1176xf32, #tpu.memory_space<smem>>
      %463 = vector.broadcast %462 : f32 to vector<8x128xf32>
      %464 = arith.mulf %463, %460 : vector<8x128xf32>
      %c6_i32_99 = arith.constant 6 : i32
      %465 = arith.muli %397, %c6_i32_99 : i32
      %c3_i32_100 = arith.constant 3 : i32
      %466 = arith.addi %465, %c3_i32_100 : i32
      %467 = arith.index_cast %466 : i32 to index
      %468 = memref.load %arg1[%467] : memref<1176xf32, #tpu.memory_space<smem>>
      %469 = vector.broadcast %468 : f32 to vector<8x128xf32>
      %470 = arith.mulf %469, %401 : vector<8x128xf32>
      %471 = arith.index_cast %466 : i32 to index
      %472 = memref.load %arg3[%471] : memref<1176xf32, #tpu.memory_space<smem>>
      %473 = vector.broadcast %472 : f32 to vector<8x128xf32>
      %474 = arith.addf %470, %473 : vector<8x128xf32>
      %475 = arith.index_cast %466 : i32 to index
      %476 = memref.load %arg2[%475] : memref<1176xf32, #tpu.memory_space<smem>>
      %477 = vector.broadcast %476 : f32 to vector<8x128xf32>
      %478 = arith.mulf %477, %396 : vector<8x128xf32>
      %479 = arith.addf %474, %478 : vector<8x128xf32>
      %cst_101 = arith.constant 0.000000e+00 : f32
      %480 = vector.broadcast %cst_101 : f32 to vector<8x128xf32>
      %481 = arith.maximumf %479, %480 : vector<8x128xf32>
      %482 = arith.index_cast %466 : i32 to index
      %483 = memref.load %arg4[%482] : memref<1176xf32, #tpu.memory_space<smem>>
      %484 = vector.broadcast %483 : f32 to vector<8x128xf32>
      %485 = arith.mulf %484, %481 : vector<8x128xf32>
      %c6_i32_102 = arith.constant 6 : i32
      %486 = arith.muli %397, %c6_i32_102 : i32
      %c4_i32_103 = arith.constant 4 : i32
      %487 = arith.addi %486, %c4_i32_103 : i32
      %488 = arith.index_cast %487 : i32 to index
      %489 = memref.load %arg1[%488] : memref<1176xf32, #tpu.memory_space<smem>>
      %490 = vector.broadcast %489 : f32 to vector<8x128xf32>
      %491 = arith.mulf %490, %401 : vector<8x128xf32>
      %492 = arith.index_cast %487 : i32 to index
      %493 = memref.load %arg3[%492] : memref<1176xf32, #tpu.memory_space<smem>>
      %494 = vector.broadcast %493 : f32 to vector<8x128xf32>
      %495 = arith.addf %491, %494 : vector<8x128xf32>
      %496 = arith.index_cast %487 : i32 to index
      %497 = memref.load %arg2[%496] : memref<1176xf32, #tpu.memory_space<smem>>
      %498 = vector.broadcast %497 : f32 to vector<8x128xf32>
      %499 = arith.mulf %498, %396 : vector<8x128xf32>
      %500 = arith.addf %495, %499 : vector<8x128xf32>
      %cst_104 = arith.constant 0.000000e+00 : f32
      %501 = vector.broadcast %cst_104 : f32 to vector<8x128xf32>
      %502 = arith.maximumf %500, %501 : vector<8x128xf32>
      %503 = arith.index_cast %487 : i32 to index
      %504 = memref.load %arg4[%503] : memref<1176xf32, #tpu.memory_space<smem>>
      %505 = vector.broadcast %504 : f32 to vector<8x128xf32>
      %506 = arith.mulf %505, %502 : vector<8x128xf32>
      %c6_i32_105 = arith.constant 6 : i32
      %507 = arith.muli %397, %c6_i32_105 : i32
      %c5_i32_106 = arith.constant 5 : i32
      %508 = arith.addi %507, %c5_i32_106 : i32
      %509 = arith.index_cast %508 : i32 to index
      %510 = memref.load %arg1[%509] : memref<1176xf32, #tpu.memory_space<smem>>
      %511 = vector.broadcast %510 : f32 to vector<8x128xf32>
      %512 = arith.mulf %511, %401 : vector<8x128xf32>
      %513 = arith.index_cast %508 : i32 to index
      %514 = memref.load %arg3[%513] : memref<1176xf32, #tpu.memory_space<smem>>
      %515 = vector.broadcast %514 : f32 to vector<8x128xf32>
      %516 = arith.addf %512, %515 : vector<8x128xf32>
      %517 = arith.index_cast %508 : i32 to index
      %518 = memref.load %arg2[%517] : memref<1176xf32, #tpu.memory_space<smem>>
      %519 = vector.broadcast %518 : f32 to vector<8x128xf32>
      %520 = arith.mulf %519, %396 : vector<8x128xf32>
      %521 = arith.addf %516, %520 : vector<8x128xf32>
      %cst_107 = arith.constant 0.000000e+00 : f32
      %522 = vector.broadcast %cst_107 : f32 to vector<8x128xf32>
      %523 = arith.maximumf %521, %522 : vector<8x128xf32>
      %524 = arith.index_cast %508 : i32 to index
      %525 = memref.load %arg4[%524] : memref<1176xf32, #tpu.memory_space<smem>>
      %526 = vector.broadcast %525 : f32 to vector<8x128xf32>
      %527 = arith.mulf %526, %523 : vector<8x128xf32>
      %528 = arith.addf %422, %443 : vector<8x128xf32>
      %529 = arith.addf %464, %485 : vector<8x128xf32>
      %530 = arith.addf %506, %527 : vector<8x128xf32>
      %531 = arith.index_cast %397 : i32 to index
      %532 = memref.load %arg5[%531] : memref<196xf32, #tpu.memory_space<smem>>
      %533 = vector.broadcast %532 : f32 to vector<8x128xf32>
      %534 = arith.addf %530, %533 : vector<8x128xf32>
      %535 = arith.addf %528, %529 : vector<8x128xf32>
      %536 = arith.addf %535, %534 : vector<8x128xf32>
      %cst_108 = arith.constant 0.000000e+00 : f32
      %537 = vector.broadcast %cst_108 : f32 to vector<8x128xf32>
      %538 = arith.maximumf %536, %537 : vector<8x128xf32>
      scf.yield %538 : vector<8x128xf32>
    }
    %c65_i32_5 = arith.constant 65 : i32
    %c0_i32_6 = arith.constant 0 : i32
    %c0_i32_7 = arith.constant 0 : i32
    %c0_i32_8 = arith.constant 0 : i32
    %5 = tpu.memref_slice %arg6[%c0_i32_6, %c0_i32_7, %c0_i32_8] : memref<196x8x128xf32, #tpu.memory_space<vmem>> -> memref<196x8x128xf32, #tpu.memory_space<vmem>>
    %c195 = arith.constant 195 : index
    %c0_9 = arith.constant 0 : index
    %c0_10 = arith.constant 0 : index
    %6 = vector.load %5[%c195, %c0_9, %c0_10] : memref<196x8x128xf32, #tpu.memory_space<vmem>>, vector<1x8x128xf32>
    %7 = vector.shape_cast %6 : vector<1x8x128xf32> to vector<8x128xf32>
    %c1170 = arith.constant 1170 : index
    %8 = memref.load %arg1[%c1170] : memref<1176xf32, #tpu.memory_space<smem>>
    %9 = vector.broadcast %8 : f32 to vector<8x128xf32>
    %10 = arith.mulf %9, %7 : vector<8x128xf32>
    %c1170_11 = arith.constant 1170 : index
    %11 = memref.load %arg3[%c1170_11] : memref<1176xf32, #tpu.memory_space<smem>>
    %12 = vector.broadcast %11 : f32 to vector<8x128xf32>
    %13 = arith.addf %10, %12 : vector<8x128xf32>
    %c1170_12 = arith.constant 1170 : index
    %14 = memref.load %arg2[%c1170_12] : memref<1176xf32, #tpu.memory_space<smem>>
    %15 = vector.broadcast %14 : f32 to vector<8x128xf32>
    %16 = arith.mulf %15, %4 : vector<8x128xf32>
    %17 = arith.addf %13, %16 : vector<8x128xf32>
    %cst = arith.constant 0.000000e+00 : f32
    %18 = vector.broadcast %cst : f32 to vector<8x128xf32>
    %19 = arith.maximumf %17, %18 : vector<8x128xf32>
    %c1170_13 = arith.constant 1170 : index
    %20 = memref.load %arg4[%c1170_13] : memref<1176xf32, #tpu.memory_space<smem>>
    %21 = vector.broadcast %20 : f32 to vector<8x128xf32>
    %22 = arith.mulf %21, %19 : vector<8x128xf32>
    %c1171 = arith.constant 1171 : index
    %23 = memref.load %arg1[%c1171] : memref<1176xf32, #tpu.memory_space<smem>>
    %24 = vector.broadcast %23 : f32 to vector<8x128xf32>
    %25 = arith.mulf %24, %7 : vector<8x128xf32>
    %c1171_14 = arith.constant 1171 : index
    %26 = memref.load %arg3[%c1171_14] : memref<1176xf32, #tpu.memory_space<smem>>
    %27 = vector.broadcast %26 : f32 to vector<8x128xf32>
    %28 = arith.addf %25, %27 : vector<8x128xf32>
    %c1171_15 = arith.constant 1171 : index
    %29 = memref.load %arg2[%c1171_15] : memref<1176xf32, #tpu.memory_space<smem>>
    %30 = vector.broadcast %29 : f32 to vector<8x128xf32>
    %31 = arith.mulf %30, %4 : vector<8x128xf32>
    %32 = arith.addf %28, %31 : vector<8x128xf32>
    %cst_16 = arith.constant 0.000000e+00 : f32
    %33 = vector.broadcast %cst_16 : f32 to vector<8x128xf32>
    %34 = arith.maximumf %32, %33 : vector<8x128xf32>
    %c1171_17 = arith.constant 1171 : index
    %35 = memref.load %arg4[%c1171_17] : memref<1176xf32, #tpu.memory_space<smem>>
    %36 = vector.broadcast %35 : f32 to vector<8x128xf32>
    %37 = arith.mulf %36, %34 : vector<8x128xf32>
    %c1172 = arith.constant 1172 : index
    %38 = memref.load %arg1[%c1172] : memref<1176xf32, #tpu.memory_space<smem>>
    %39 = vector.broadcast %38 : f32 to vector<8x128xf32>
    %40 = arith.mulf %39, %7 : vector<8x128xf32>
    %c1172_18 = arith.constant 1172 : index
    %41 = memref.load %arg3[%c1172_18] : memref<1176xf32, #tpu.memory_space<smem>>
    %42 = vector.broadcast %41 : f32 to vector<8x128xf32>
    %43 = arith.addf %40, %42 : vector<8x128xf32>
    %c1172_19 = arith.constant 1172 : index
    %44 = memref.load %arg2[%c1172_19] : memref<1176xf32, #tpu.memory_space<smem>>
    %45 = vector.broadcast %44 : f32 to vector<8x128xf32>
    %46 = arith.mulf %45, %4 : vector<8x128xf32>
    %47 = arith.addf %43, %46 : vector<8x128xf32>
    %cst_20 = arith.constant 0.000000e+00 : f32
    %48 = vector.broadcast %cst_20 : f32 to vector<8x128xf32>
    %49 = arith.maximumf %47, %48 : vector<8x128xf32>
    %c1172_21 = arith.constant 1172 : index
    %50 = memref.load %arg4[%c1172_21] : memref<1176xf32, #tpu.memory_space<smem>>
    %51 = vector.broadcast %50 : f32 to vector<8x128xf32>
    %52 = arith.mulf %51, %49 : vector<8x128xf32>
    %c1173 = arith.constant 1173 : index
    %53 = memref.load %arg1[%c1173] : memref<1176xf32, #tpu.memory_space<smem>>
    %54 = vector.broadcast %53 : f32 to vector<8x128xf32>
    %55 = arith.mulf %54, %7 : vector<8x128xf32>
    %c1173_22 = arith.constant 1173 : index
    %56 = memref.load %arg3[%c1173_22] : memref<1176xf32, #tpu.memory_space<smem>>
    %57 = vector.broadcast %56 : f32 to vector<8x128xf32>
    %58 = arith.addf %55, %57 : vector<8x128xf32>
    %c1173_23 = arith.constant 1173 : index
    %59 = memref.load %arg2[%c1173_23] : memref<1176xf32, #tpu.memory_space<smem>>
    %60 = vector.broadcast %59 : f32 to vector<8x128xf32>
    %61 = arith.mulf %60, %4 : vector<8x128xf32>
    %62 = arith.addf %58, %61 : vector<8x128xf32>
    %cst_24 = arith.constant 0.000000e+00 : f32
    %63 = vector.broadcast %cst_24 : f32 to vector<8x128xf32>
    %64 = arith.maximumf %62, %63 : vector<8x128xf32>
    %c1173_25 = arith.constant 1173 : index
    %65 = memref.load %arg4[%c1173_25] : memref<1176xf32, #tpu.memory_space<smem>>
    %66 = vector.broadcast %65 : f32 to vector<8x128xf32>
    %67 = arith.mulf %66, %64 : vector<8x128xf32>
    %c1174 = arith.constant 1174 : index
    %68 = memref.load %arg1[%c1174] : memref<1176xf32, #tpu.memory_space<smem>>
    %69 = vector.broadcast %68 : f32 to vector<8x128xf32>
    %70 = arith.mulf %69, %7 : vector<8x128xf32>
    %c1174_26 = arith.constant 1174 : index
    %71 = memref.load %arg3[%c1174_26] : memref<1176xf32, #tpu.memory_space<smem>>
    %72 = vector.broadcast %71 : f32 to vector<8x128xf32>
    %73 = arith.addf %70, %72 : vector<8x128xf32>
    %c1174_27 = arith.constant 1174 : index
    %74 = memref.load %arg2[%c1174_27] : memref<1176xf32, #tpu.memory_space<smem>>
    %75 = vector.broadcast %74 : f32 to vector<8x128xf32>
    %76 = arith.mulf %75, %4 : vector<8x128xf32>
    %77 = arith.addf %73, %76 : vector<8x128xf32>
    %cst_28 = arith.constant 0.000000e+00 : f32
    %78 = vector.broadcast %cst_28 : f32 to vector<8x128xf32>
    %79 = arith.maximumf %77, %78 : vector<8x128xf32>
    %c1174_29 = arith.constant 1174 : index
    %80 = memref.load %arg4[%c1174_29] : memref<1176xf32, #tpu.memory_space<smem>>
    %81 = vector.broadcast %80 : f32 to vector<8x128xf32>
    %82 = arith.mulf %81, %79 : vector<8x128xf32>
    %c1175 = arith.constant 1175 : index
    %83 = memref.load %arg1[%c1175] : memref<1176xf32, #tpu.memory_space<smem>>
    %84 = vector.broadcast %83 : f32 to vector<8x128xf32>
    %85 = arith.mulf %84, %7 : vector<8x128xf32>
    %c1175_30 = arith.constant 1175 : index
    %86 = memref.load %arg3[%c1175_30] : memref<1176xf32, #tpu.memory_space<smem>>
    %87 = vector.broadcast %86 : f32 to vector<8x128xf32>
    %88 = arith.addf %85, %87 : vector<8x128xf32>
    %c1175_31 = arith.constant 1175 : index
    %89 = memref.load %arg2[%c1175_31] : memref<1176xf32, #tpu.memory_space<smem>>
    %90 = vector.broadcast %89 : f32 to vector<8x128xf32>
    %91 = arith.mulf %90, %4 : vector<8x128xf32>
    %92 = arith.addf %88, %91 : vector<8x128xf32>
    %cst_32 = arith.constant 0.000000e+00 : f32
    %93 = vector.broadcast %cst_32 : f32 to vector<8x128xf32>
    %94 = arith.maximumf %92, %93 : vector<8x128xf32>
    %c1175_33 = arith.constant 1175 : index
    %95 = memref.load %arg4[%c1175_33] : memref<1176xf32, #tpu.memory_space<smem>>
    %96 = vector.broadcast %95 : f32 to vector<8x128xf32>
    %97 = arith.mulf %96, %94 : vector<8x128xf32>
    %98 = arith.addf %22, %37 : vector<8x128xf32>
    %99 = arith.addf %52, %67 : vector<8x128xf32>
    %100 = arith.addf %82, %97 : vector<8x128xf32>
    %c195_34 = arith.constant 195 : index
    %101 = memref.load %arg5[%c195_34] : memref<196xf32, #tpu.memory_space<smem>>
    %102 = vector.broadcast %101 : f32 to vector<8x128xf32>
    %103 = arith.addf %100, %102 : vector<8x128xf32>
    %104 = arith.addf %98, %99 : vector<8x128xf32>
    %105 = arith.addf %104, %103 : vector<8x128xf32>
    %106 = arith.negf %105 : vector<8x128xf32>
    %107 = math.exp %106 : vector<8x128xf32>
    %cst_35 = arith.constant 1.000000e+00 : f32
    %108 = vector.broadcast %cst_35 : f32 to vector<8x128xf32>
    %109 = arith.addf %108, %107 : vector<8x128xf32>
    %110 = arith.divf %108, %109 : vector<8x128xf32>
    %c0_36 = arith.constant 0 : index
    %c0_37 = arith.constant 0 : index
    %111 = vector.load %arg7[%c0_36, %c0_37] : memref<8x128xf32, #tpu.memory_space<vmem>>, vector<8x128xf32>
    tpu.vector_store %arg7[%c0_36, %c0_37], %110 {strides = array<i32>} : memref<8x128xf32, #tpu.memory_space<vmem>>, vector<8x128xf32>,
    return
  }
  func.func @transform_0(%arg0: i32) -> i32 {
    %c0_i32 = arith.constant 0 : i32
    %c0_i32_0 = arith.constant 0 : i32
    return %c0_i32 : i32
  }
  func.func @transform_1(%arg0: i32) -> i32 {
    %c0_i32 = arith.constant 0 : i32
    %c0_i32_0 = arith.constant 0 : i32
    return %c0_i32 : i32
  }
  func.func @transform_2(%arg0: i32) -> i32 {
    %c0_i32 = arith.constant 0 : i32
    %c0_i32_0 = arith.constant 0 : i32
    return %c0_i32 : i32
  }
  func.func @transform_3(%arg0: i32) -> i32 {
    %c0_i32 = arith.constant 0 : i32
    %c0_i32_0 = arith.constant 0 : i32
    return %c0_i32 : i32
  }
  func.func @transform_4(%arg0: i32) -> i32 {
    %c0_i32 = arith.constant 0 : i32
    %c0_i32_0 = arith.constant 0 : i32
    return %c0_i32 : i32
  }
  func.func @transform_5(%arg0: i32) -> (i32, i32, i32) {
    %c0_i32 = arith.constant 0 : i32
    %c0_i32_0 = arith.constant 0 : i32
    %c0_i32_1 = arith.constant 0 : i32
    return %c0_i32, %arg0, %c0_i32_0 : i32, i32, i32
  }
  func.func @transform_6(%arg0: i32) -> (i32, i32) {
    %c0_i32 = arith.constant 0 : i32
    %c0_i32_0 = arith.constant 0 : i32
    return %arg0, %c0_i32 : i32, i32
  }
}

</mosaic_0001>

<bundles_post_ra>
// kernel: rnn_forward.1
= control target key start
LH: loop header
LB: loop body
LE: loop exit
PB: predicated region body
PF: predicated region fallthrough
CT: control target
= control target key end

     0   :  { %11 = vsyncpa [#allocation3], 0  ;;  %s1145_s0 = inlined_call_operand.vmem [shape: f32[1176], index: 0, kind: input, shape index: {}]   ;;  %s1146_s1 = inlined_call_operand.vmem [shape: f32[1176], index: 1, kind: input, shape index: {}]   ;;  %s1147_s2 = inlined_call_operand.vmem [shape: f32[1176], index: 2, kind: input, shape index: {}]   ;;  %s1148_s3 = inlined_call_operand.vmem [shape: f32[1176], index: 3, kind: input, shape index: {}]   ;;  %s1149_s4 = inlined_call_operand.vmem [shape: f32[196], index: 4, kind: input, shape index: {}]   ;;  %s1150_s5 = inlined_call_operand.vmem [shape: f32[196,8,128], index: 5, kind: input, shape index: {}]   ;;  %s1151_s6 = inlined_call_operand.vmem [shape: f32[8,128], index: 6, kind: output, shape index: {}]  }
   0x1   :  { %12 = vsyncpa [#allocation5], 0  ;;  %s30_s23 = sshll.u32 %s1146_s1, 4  ;;  %s31_s23 = int_to_ptr.vmem [resolvable:$true] %s30_s23 }
   0x2   :  { %13 = vsyncpa [#allocation8], 0  ;;  %s50_s26 = sshll.u32 %s1148_s3, 4  ;;  %s582_s27 = scalar_lea.vmem %s31_s23, 160  ;;  %s51_s26 = int_to_ptr.vmem [resolvable:$true] %s50_s26 }
   0x3   :  { %p583_p0 = scmp.ne.s32.totalorder %s31_s23, %s582_s27  ;;  %s586_s28 = scalar_lea.vmem %s31_s23, 256 }
   0x4   :  { %p587_p1 = scmp.lt.s32.totalorder %s31_s23, %s31_s23  ;;  %p588_p2 = scmp.lt.s32.totalorder %s586_s28, %s582_s27 }
   0x6   :  { %p589_p3 = por %p588_p2, %p587_p1 }
   0x8   :  { %p590_p4 = pnand %p589_p3, %p583_p0 }
   0xa   :  { %593 = shalt.err (!%p590_p4)
}
   0xb   :  { %s664_s29 = smov [#allocation4]   ;;  %s594_s30 = scalar_lea.vmem %s51_s26, 160 }
   0xc   :  { %33 = dma.vmem_to_smem %s31_s23, 160, %s664_s29, [#allocation5]  }
   0xd   :  { %p595_p5 = scmp.ne.s32.totalorder %s51_s26, %s594_s30  ;;  %s598_s1 = scalar_lea.vmem %s51_s26, 256 }
   0xe   :  { %p599_p6 = scmp.lt.s32.totalorder %s51_s26, %s51_s26  ;;  %p600_p7 = scmp.lt.s32.totalorder %s598_s1, %s594_s30 }
  0x10   :  { %p601_p8 = por %p600_p7, %p599_p6 }
  0x12   :  { %p602_p9 = pnand %p601_p8, %p595_p5 }
  0x14   :  { %605 = shalt.err (!%p602_p9)
}
  0x15   :  { %s665_s3 = smov [#allocation7]   ;;  %s20_s9 = sshll.u32 %s1145_s0, 4  ;;  %s21_s9 = int_to_ptr.vmem [resolvable:$true] %s20_s9 }
  0x16   :  { %53 = dma.vmem_to_smem %s51_s26, 160, %s665_s3, [#allocation8]  }
  0x17   :  { %s40_s12 = sshll.u32 %s1147_s2, 4  ;;  %s606_s13 = scalar_lea.vmem %s21_s9, 160  ;;  %s41_s12 = int_to_ptr.vmem [resolvable:$true] %s40_s12 }
  0x18   :  { %p607_p10 = scmp.ne.s32.totalorder %s21_s9, %s606_s13  ;;  %s610_s14 = scalar_lea.vmem %s21_s9, 256 }
  0x19   :  { %p611_p11 = scmp.lt.s32.totalorder %s21_s9, %s21_s9  ;;  %p612_p12 = scmp.lt.s32.totalorder %s610_s14, %s606_s13 }
  0x1b   :  { %p613_p13 = por %p612_p12, %p611_p11 }
  0x1d   :  { %p614_p0 = pnand %p613_p13, %p607_p10 }
  0x1f   :  { %617 = shalt.err (!%p614_p0)
}
  0x20   :  { %s666_s15 = smov [#allocation2]   ;;  %s618_s16 = scalar_lea.vmem %s41_s12, 160 }
  0x21   :  { %23 = dma.vmem_to_smem %s21_s9, 160, %s666_s15, [#allocation3]  }
  0x22   :  { %p619_p1 = scmp.ne.s32.totalorder %s41_s12, %s618_s16  ;;  %s622_s17 = scalar_lea.vmem %s41_s12, 256 }
  0x23   :  { %p623_p2 = scmp.lt.s32.totalorder %s41_s12, %s41_s12  ;;  %p624_p3 = scmp.lt.s32.totalorder %s622_s17, %s618_s16 }
  0x25   :  { %p625_p4 = por %p624_p3, %p623_p2 }
  0x27   :  { %p626_p5 = pnand %p625_p4, %p619_p1 }
  0x29   :  { %629 = shalt.err (!%p626_p5)
}
  0x2a   :  { %s667_s0 = smov [#allocation6]   ;;  %s60_s19 = sshll.u32 %s1149_s4, 4  ;;  %s61_s19 = int_to_ptr.vmem [resolvable:$true] %s60_s19 }
  0x2b   :  { %43 = dma.vmem_to_smem %s41_s12, 160, %s667_s0, [#allocation5]  }
  0x2c   :  { %s630_s20 = scalar_lea.vmem %s61_s19, 32  ;;  %p635_p7 = scmp.lt.s32.totalorder %s61_s19, %s61_s19 }
  0x2d   :  { %p631_p6 = scmp.ne.s32.totalorder %s61_s19, %s630_s20  ;;  %p636_p8 = scmp.lt.s32.totalorder %s630_s20, %s630_s20 }
  0x2f   :  { %p637_p9 = por %p636_p8, %p635_p7 }
  0x31   :  { %p638_p10 = pnand %p637_p9, %p631_p6 }
  0x33   :  { %641 = shalt.err (!%p638_p10)
}
  0x34   :  { %s668_s21 = smov [#allocation9]  }
  0x35   :  { %63 = dma.vmem_to_smem %s61_s19, 32, %s668_s21, [#allocation8]  }
  0x36   :  { %650 = dma.done.wait [#allocation3], 160  }
  0x37   :  { %651 = vsyncadd [#allocation3], 4294967136 }
  0x38   :  { %652 = dma.done.wait [#allocation5], 320  }
  0x39   :  { %653 = vsyncadd [#allocation5], 4294966976 }
  0x3a   :  { %654 = dma.done.wait [#allocation8], 192  }
  0x3b   :  { %655 = vsyncadd [#allocation8], 4294967104 }
  0x3c   :  { %81 = sfence }
  0x3d   :  { %v82_v0 = vld [vmem:[%s1150_s5] sm:$0xff]   ;;  %s724_s4 = smov 0  }
  0x3e LB: > { %s733_s24 = smul.u32 3, %s662_s4  ;;  %s662_s4 = sphi %s724_s4, %s88_s4   ;;  %v658_v0 = vphi %v82_v0, %v1153_v0  }
  0x3f   : > { %s525_s25 = smul.u32 24, %s662_s4 }
  0x40   : > { %s737_s26 = smul.u32 18, %s662_s4  ;;  %s193_s7 = sadd.s32 1, %s733_s24 }
  0x41   : > { %s742_s29 = scalar_lea.vmem %s1150_s5, %s525_s25  ;;  %s88_s4 = sadd.s32 1, %s662_s4  }
  0x42   : > { %s95_s30 = sld [smem:[#allocation2 + %s737_s26]]  ;;  %s109_s8 = sadd.s32 1, %s737_s26  ;;  %v753_v1 = vld [vmem:[%s742_s29] sm:$0xff]  ;;  %v527_v60 = vld [vmem:[%s742_s29 + $0x8] sm:$0xff] }
  0x43   : > { %s98_s1 = sld [smem:[#allocation6 + %s737_s26]]  ;;  %s124_s9 = sadd.s32 2, %s737_s26 }
  0x44   : > { %s101_s3 = sld [smem:[#allocation4 + %s737_s26]]  ;;  %s139_s0 = sadd.s32 3, %s737_s26 }
  0x45   : > { %s110_s10 = sld [smem:[#allocation2 + %s109_s8]]  ;;  %s765_s2 = sadd.s32 4, %s737_s26 }
  0x46   : > { %s750_s11 = sld [smem:[#allocation6 + %s109_s8]]  ;;  %s169_s28 = sadd.s32 5, %s737_s26 }
  0x47   : > { %s756_s12 = sld [smem:[#allocation7 + %s737_s26]]  ;;  %p85_p11 = scmp.ge.s32.totalorder %s88_s4, 65  }
  0x48   : > { %s116_s13 = sld [smem:[#allocation4 + %s109_s8]]  ;;  %v96_v2 = vstv %s95_s30  ;;  %s795_s30 = smul.u32 6, %s193_s7 }
  0x49   : > { %s125_s14 = sld [smem:[#allocation2 + %s124_s9]]  ;;  %v99_v3 = vstv %s98_s1  ;;  %v97_v4 = vmul.f32 %v96_v2, %v753_v1 }
  0x4a   : > { %s758_s15 = sld [smem:[#allocation6 + %s124_s9]]  ;;  %v102_v5 = vstv %s101_s3 }
  0x4b   : > { %s760_s16 = sld [smem:[#allocation7 + %s109_s8]]  ;;  %v103_v6 = vmul.f32 %v658_v0, %v102_v5  ;;  %v100_v7 = vadd.f32 %v99_v3, %v97_v4  ;;  %v111_v8 = vstv %s110_s10 }
  0x4c   : > { %s131_s17 = sld [smem:[#allocation4 + %s124_s9]]  ;;  %v114_v9 = vstv %s750_s11  ;;  %v112_v10 = vmul.f32 %v111_v8, %v753_v1  ;;  %s823_s11 = sadd.s32 1, %s795_s30 }
  0x4d   : > { %s768_s18 = sld [smem:[#allocation2 + %s139_s0]]  ;;  %v104_v12 = vadd.f32 %v103_v6, %v100_v7  ;;  %v107_v25 = vstv %s756_s12  ;;  %s826_s12 = sadd.s32 2, %s795_s30 }
  0x4e   : > { %s770_s19 = sld [smem:[#allocation6 + %s139_s0]]  ;;  %v117_v11 = vstv %s116_s13  ;;  %v115_v16 = vadd.f32 %v114_v9, %v112_v10 }
  0x4f   : > { %s773_s20 = sld [smem:[#allocation7 + %s124_s9]]  ;;  %v118_v13 = vmul.f32 %v658_v0, %v117_v11  ;;  %v126_v14 = vstv %s125_s14  ;;  %v105_v24 = vmax.f32 %v104_v12, 0.0 }
  0x50   : > { %s775_s21 = sld [smem:[#allocation4 + %s139_s0]]  ;;  %v129_v15 = vstv %s758_s15  ;;  %v127_v17 = vmul.f32 %v126_v14, %v753_v1 }
  0x51   : > { %s779_s22 = sld [smem:[#allocation2 + %s765_s2]]  ;;  %v119_v20 = vadd.f32 %v118_v13, %v115_v16  ;;  %v122_v36 = vstv %s760_s16  ;;  %v108_v44 = vmul.f32 %v107_v25, %v105_v24 }
  0x52   : > { %s782_s23 = sld [smem:[#allocation6 + %s765_s2]]  ;;  %v132_v18 = vstv %s131_s17  ;;  %v130_v21 = vadd.f32 %v129_v15, %v127_v17 }
  0x53   : > { %s786_s25 = sld [smem:[#allocation7 + %s139_s0]]  ;;  %v133_v19 = vmul.f32 %v658_v0, %v132_v18  ;;  %v141_v22 = vstv %s768_s18  ;;  %v120_v28 = vmax.f32 %v119_v20, 0.0 }
  0x54   : > { %s789_s27 = sld [smem:[#allocation4 + %s765_s2]]  ;;  %v144_v23 = vstv %s770_s19  ;;  %v142_v26 = vmul.f32 %v141_v22, %v753_v1  ;;  %s862_s19 = sadd.s32 3, %s795_s30 }
  0x55   : > { %s798_s1 = sld [smem:[#allocation2 + %s169_s28]]  ;;  %v134_v29 = vadd.f32 %v133_v19, %v130_v21  ;;  %v137_v38 = vstv %s773_s20  ;;  %v123_v48 = vmul.f32 %v122_v36, %v120_v28  ;;  %s865_s20 = sadd.s32 4, %s795_s30 }
  0x56   : > { %s800_s3 = sld [smem:[#allocation6 + %s169_s28]]  ;;  %v147_v27 = vstv %s775_s21  ;;  %v145_v32 = vadd.f32 %v144_v23, %v142_v26 }
  0x57   : > { %s804_s8 = sld [smem:[#allocation4 + %s169_s28]]  ;;  %v148_v30 = vmul.f32 %v658_v0, %v147_v27  ;;  %v156_v31 = vstv %s779_s22  ;;  %v135_v37 = vmax.f32 %v134_v29, 0.0  ;;  %v184_v59 = vadd.f32 %v123_v48, %v108_v44 }
  0x58   : > { %s810_s26 = sld [smem:[#allocation7 + %s765_s2]]  ;;  %v157_v33 = vmul.f32 %v156_v31, %v753_v1  ;;  %v159_v34 = vstv %s782_s23 }
  0x59   : > { %s814_s9 = sld [smem:[#allocation7 + %s169_s28]]  ;;  %v149_v40 = vadd.f32 %v148_v30, %v145_v32  ;;  %v152_v45 = vstv %s786_s25  ;;  %v138_v52 = vmul.f32 %v137_v38, %v135_v37 }
  0x5a   : > { %s817_s10 = sld [smem:[#allocation2 + %s795_s30]]  ;;  %v162_v35 = vstv %s789_s27  ;;  %v160_v41 = vadd.f32 %v159_v34, %v157_v33 }
  0x5b   : > { %v163_v39 = vmul.f32 %v658_v0, %v162_v35  ;;  %s832_s13 = sld [smem:[#allocation9 + %s733_s24]]  ;;  %v171_v42 = vstv %s798_s1  ;;  %v150_v49 = vmax.f32 %v149_v40, 0.0 }
  0x5c   : > { %s835_s14 = sld [smem:[#allocation2 + %s823_s11]]  ;;  %v174_v43 = vstv %s800_s3  ;;  %v172_v46 = vmul.f32 %v171_v42, %v753_v1 }
  0x5d   : > { %s840_s15 = sld [smem:[#allocation6 + %s795_s30]]  ;;  %v177_v47 = vstv %s804_s8  ;;  %v164_v50 = vadd.f32 %v163_v39, %v160_v41  ;;  %v153_v54 = vmul.f32 %v152_v45, %v150_v49 }
  0x5e   : > { %s843_s16 = sld [smem:[#allocation4 + %s795_s30]]  ;;  %v178_v51 = vmul.f32 %v658_v0, %v177_v47  ;;  %v175_v53 = vadd.f32 %v174_v43, %v172_v46  ;;  %v167_v56 = vstv %s810_s26  ;;  %s900_s26 = sadd.s32 5, %s795_s30 }
  0x5f   : > { %s849_s17 = sld [smem:[#allocation7 + %s795_s30]]  ;;  %v165_v55 = vmax.f32 %v164_v50, 0.0  ;;  %v182_v58 = vstv %s814_s9  ;;  %v185_v0 = vadd.f32 %v153_v54, %v138_v52  ;;  %v988_v52 = vld [vmem:[%s742_s29 + $0x10] sm:$0xff] }
  0x60   : > { %s852_s0 = sld [smem:[#allocation2 + %s826_s12]]  ;;  %v179_v57 = vadd.f32 %v178_v51, %v175_v53  ;;  %v199_v61 = vstv %s817_s10 }
  0x61   : > { %s856_s2 = sld [smem:[#allocation6 + %s823_s11]]  ;;  %v168_v62 = vmul.f32 %v167_v56, %v165_v55  ;;  %v200_v3 = vmul.f32 %v527_v60, %v199_v61  ;;  %v188_v5 = vstv %s832_s13  ;;  %v190_v10 = vadd.f32 %v185_v0, %v184_v59 }
  0x62   : > { %s859_s18 = sld [smem:[#allocation4 + %s823_s11]]  ;;  %v180_v63 = vmax.f32 %v179_v57, 0.0  ;;  %v214_v1 = vstv %s835_s14  ;;  %s296_s14 = sadd.s32 2, %s733_s24 }
  0x63   : > { %s869_s21 = sld [smem:[#allocation7 + %s823_s11]]  ;;  %v202_v6 = vstv %s840_s15  ;;  %v215_v7 = vmul.f32 %v527_v60, %v214_v1 }
  0x64   : > { %s872_s22 = sld [smem:[#allocation2 + %s862_s19]]  ;;  %v183_v2 = vmul.f32 %v182_v58, %v180_v63  ;;  %v205_v12 = vstv %s843_s16  ;;  %v203_v17 = vadd.f32 %v202_v6, %v200_v3 }
  0x65   : > { %s875_s23 = sld [smem:[#allocation6 + %s826_s12]]  ;;  %v210_v13 = vstv %s849_s17 }
  0x66   : > { %s878_s25 = sld [smem:[#allocation4 + %s826_s12]]  ;;  %v229_v4 = vstv %s852_s0  ;;  %v186_v9 = vadd.f32 %v183_v2, %v168_v62 }
  0x67   : > { %s884_s27 = sld [smem:[#allocation6 + %s862_s19]]  ;;  %v217_v11 = vstv %s856_s2  ;;  %v230_v14 = vmul.f32 %v527_v60, %v229_v4 }
  0x68   : > { %s887_s28 = sld [smem:[#allocation2 + %s865_s20]]  ;;  %v189_v16 = vadd.f32 %v188_v5, %v186_v9  ;;  %v218_v20 = vadd.f32 %v217_v11, %v215_v7  ;;  %v220_v21 = vstv %s859_s18 }
  0x69   : > { %s891_s1 = sld [smem:[#allocation4 + %s862_s19]]  ;;  %v225_v36 = vstv %s869_s21 }
  0x6a   : > { %s894_s3 = sld [smem:[#allocation6 + %s865_s20]]  ;;  %v244_v8 = vstv %s872_s22  ;;  %v191_v24 = vadd.f32 %v190_v10, %v189_v16 }
  0x6b   : > { %s897_s8 = sld [smem:[#allocation4 + %s865_s20]]  ;;  %v232_v18 = vstv %s875_s23  ;;  %v245_v19 = vmul.f32 %v527_v60, %v244_v8 }
  0x6c   : > { %s904_s9 = sld [smem:[#allocation2 + %s900_s26]]  ;;  %v233_v28 = vadd.f32 %v232_v18, %v230_v14  ;;  %v235_v29 = vstv %s878_s25  ;;  %v192_v32 = vmax.f32 %v191_v24, 0.0 }
  0x6d   : > { %s907_s10 = sld [smem:[#allocation6 + %s900_s26]]  ;;  %v247_v22 = vstv %s884_s27 }
  0x6e   : > { %s912_s30 = sld [smem:[#allocation7 + %s826_s12]]  ;;  %v259_v15 = vstv %s887_s28  ;;  %s928_s12 = smul.u32 6, %s296_s14  ;;  %v248_v33 = vadd.f32 %v247_v22, %v245_v19  ;;  %v206_v40 = vmul.f32 %v205_v12, %v192_v32  ;;  %v221_v41 = vmul.f32 %v220_v21, %v192_v32 }
  0x6f   : > { %s916_s11 = sld [smem:[#allocation4 + %s900_s26]]  ;;  %v260_v23 = vmul.f32 %v527_v60, %v259_v15  ;;  %v250_v30 = vstv %s891_s1  ;;  %v236_v42 = vmul.f32 %v235_v29, %v192_v32 }
  0x70   : > { %s923_s13 = sld [smem:[#allocation7 + %s862_s19]]  ;;  %v262_v25 = vstv %s894_s3  ;;  %s955_s19 = sadd.s32 1, %s928_s12  ;;  %v251_v43 = vmul.f32 %v250_v30, %v192_v32  ;;  %v207_v48 = vadd.f32 %v206_v40, %v203_v17  ;;  %v222_v49 = vadd.f32 %v221_v41, %v218_v20 }
  0x71   : > { %s932_s15 = sld [smem:[#allocation7 + %s865_s20]]  ;;  %v265_v34 = vstv %s897_s8  ;;  %v263_v38 = vadd.f32 %v262_v25, %v260_v23  ;;  %v237_v50 = vadd.f32 %v236_v42, %v233_v28  ;;  %s991_s1 = sadd.s32 3, %s928_s12 }
  0x72   : > { %s937_s16 = sld [smem:[#allocation7 + %s900_s26]]  ;;  %v274_v26 = vstv %s904_s9  ;;  %v266_v45 = vmul.f32 %v265_v34, %v192_v32  ;;  %v252_v51 = vadd.f32 %v251_v43, %v248_v33  ;;  %s994_s3 = sadd.s32 4, %s928_s12  ;;  %v208_v57 = vmax.f32 %v207_v48, 0.0 }
  0x73   : > { %s940_s0 = sld [smem:[#allocation2 + %s928_s12]]  ;;  %v277_v27 = vstv %s907_s10  ;;  %v275_v31 = vmul.f32 %v527_v60, %v274_v26  ;;  %v223_v58 = vmax.f32 %v222_v49, 0.0  ;;  %v238_v59 = vmax.f32 %v237_v50, 0.0 }
  0x74   : > { %s947_s2 = sld [smem:[#allocation9 + %s193_s7]]  ;;  %s963_s7 = sadd.s32 2, %s928_s12  ;;  %v240_v37 = vstv %s912_s30  ;;  %v267_v53 = vadd.f32 %v266_v45, %v263_v38  ;;  %v253_v60 = vmax.f32 %v252_v51, 0.0  ;;  %v211_v0 = vmul.f32 %v210_v13, %v208_v57 }
  0x75   : > { %s952_s18 = sld [smem:[#allocation6 + %s928_s12]]  ;;  %v280_v35 = vstv %s916_s11  ;;  %v278_v39 = vadd.f32 %v277_v27, %v275_v31  ;;  %v226_v1 = vmul.f32 %v225_v36, %v223_v58  ;;  %v241_v2 = vmul.f32 %v240_v37, %v238_v59 }
  0x76   : > { %s960_s20 = sld [smem:[#allocation4 + %s928_s12]]  ;;  %v255_v44 = vstv %s923_s13  ;;  %v281_v46 = vmul.f32 %v280_v35, %v192_v32  ;;  %v268_v61 = vmax.f32 %v267_v53, 0.0 }
  0x77   : > { %s968_s22 = sld [smem:[#allocation7 + %s928_s12]]  ;;  %v270_v54 = vstv %s932_s15  ;;  %v256_v3 = vmul.f32 %v255_v44, %v253_v60  ;;  %v287_v8 = vadd.f32 %v226_v1, %v211_v0 }
  0x78   : > { %s971_s23 = sld [smem:[#allocation2 + %s955_s19]]  ;;  %v282_v55 = vadd.f32 %v281_v46, %v278_v39  ;;  %v285_v56 = vstv %s937_s16  ;;  %v271_v4 = vmul.f32 %v270_v54, %v268_v61  ;;  %s375_s16 = sadd.s32 5, %s928_s12 }
  0x79   : > { %s974_s25 = sld [smem:[#allocation6 + %s955_s19]]  ;;  %v302_v47 = vstv %s940_s0  ;;  %v288_v9 = vadd.f32 %v256_v3, %v241_v2 }
  0x7a   : > { %s977_s21 = sld [smem:[#allocation4 + %s955_s19]]  ;;  %v283_v62 = vmax.f32 %v282_v55, 0.0  ;;  %v303_v63 = vmul.f32 %v988_v52, %v302_v47  ;;  %v291_v10 = vstv %s947_s2 }
  0x7b   : > { %s982_s27 = sld [smem:[#allocation2 + %s963_s7]]  ;;  %v305_v6 = vstv %s952_s18  ;;  %v293_v16 = vadd.f32 %v288_v9, %v287_v8 }
  0x7c   : > { %s985_s28 = sld [smem:[#allocation6 + %s963_s7]]  ;;  %v286_v5 = vmul.f32 %v285_v56, %v283_v62  ;;  %v306_v17 = vadd.f32 %v305_v6, %v303_v63  ;;  %v308_v18 = vstv %s960_s20 }
  0x7d   : > { %s999_s8 = sld [smem:[#allocation2 + %s991_s1]]  ;;  %v313_v40 = vstv %s968_s22 }
  0x7e   : > { %s1002_s26 = sld [smem:[#allocation6 + %s991_s1]]  ;;  %v317_v7 = vstv %s971_s23  ;;  %v289_v12 = vadd.f32 %v286_v5, %v271_v4 }
  0x7f   : > { %s1005_s29 = sld [smem:[#allocation4 + %s963_s7]]  ;;  %v318_v11 = vmul.f32 %v988_v52, %v317_v7  ;;  %v320_v13 = vstv %s974_s25 }
  0x80   : > { %s1008_s9 = sld [smem:[#allocation4 + %s991_s1]]  ;;  %v292_v20 = vadd.f32 %v291_v10, %v289_v12  ;;  %v323_v21 = vstv %s977_s21 }
  0x81   : > { %s1012_s10 = sld [smem:[#allocation2 + %s994_s3]]  ;;  %v332_v14 = vstv %s982_s27  ;;  %v321_v24 = vadd.f32 %v320_v13, %v318_v11 }
  0x82   : > { %s1015_s30 = sld [smem:[#allocation6 + %s994_s3]]  ;;  %v335_v15 = vstv %s985_s28  ;;  %v333_v19 = vmul.f32 %v988_v52, %v332_v14  ;;  %v294_v28 = vadd.f32 %v293_v16, %v292_v20  ;;  %v530_v16 = vld [vmem:[%s1150_s5 + $0x618] sm:$0xff] (%p85_p11) }
  0x83   : > { %s1020_s11 = sld [smem:[#allocation7 + %s955_s19]]  ;;  %v347_v22 = vstv %s999_s8 }
  0x84   : > { %s1023_s13 = sld [smem:[#allocation4 + %s994_s3]]  ;;  %v350_v23 = vstv %s1002_s26  ;;  %v336_v25 = vadd.f32 %v335_v15, %v333_v19  ;;  %v348_v27 = vmul.f32 %v988_v52, %v347_v22  ;;  %v295_v36 = vmax.f32 %v294_v28, 0.0 }
  0x85   : > { %s1028_s15 = sld [smem:[#allocation7 + %s963_s7]]  ;;  %v338_v26 = vstv %s1005_s29 }
  0x86   : > { %s1033_s17 = sld [smem:[#allocation2 + %s375_s16]]  ;;  %v353_v29 = vstv %s1008_s9  ;;  %v351_v32 = vadd.f32 %v350_v23, %v348_v27  ;;  %v309_v44 = vmul.f32 %v308_v18, %v295_v36  ;;  %v324_v45 = vmul.f32 %v323_v21, %v295_v36 }
  0x87   : > { %s1035_s0 = sld [smem:[#allocation6 + %s375_s16]]  ;;  %v362_v30 = vstv %s1012_s10  ;;  %v339_v46 = vmul.f32 %v338_v26, %v295_v36  ;;  %v354_v47 = vmul.f32 %v353_v29, %v295_v36 }
  0x88   : > { %s1040_s12 = sld [smem:[#allocation4 + %s375_s16]]  ;;  %v365_v31 = vstv %s1015_s30  ;;  %v363_v33 = vmul.f32 %v988_v52, %v362_v30  ;;  %v310_v53 = vadd.f32 %v309_v44, %v306_v17 }
  0x89   : > { %s1045_s2 = sld [smem:[#allocation7 + %s991_s1]]  ;;  %v328_v41 = vstv %s1020_s11  ;;  %v340_v54 = vadd.f32 %v339_v46, %v336_v25  ;;  %v355_v55 = vadd.f32 %v354_v47, %v351_v32 }
  0x8a   : > { %s1053_s18 = sld [smem:[#allocation7 + %s994_s3]]  ;;  %v368_v34 = vstv %s1023_s13  ;;  %v366_v43 = vadd.f32 %v365_v31, %v363_v33  ;;  %v311_v60 = vmax.f32 %v310_v53, 0.0 }
  0x8b   : > { %s1055_s19 = sld [smem:[#allocation7 + %s375_s16]]  ;;  %v343_v42 = vstv %s1028_s15  ;;  %v369_v49 = vmul.f32 %v368_v34, %v295_v36  ;;  %v341_v62 = vmax.f32 %v340_v54, 0.0  ;;  %v356_v63 = vmax.f32 %v355_v55, 0.0 }
  0x8c   : > { %v377_v35 = vstv %s1033_s17  ;;  %s393_s20 = sld [smem:[#allocation9 + %s296_s14]]  ;;  %v314_v2 = vmul.f32 %v313_v40, %v311_v60 }
  0x8d   : > { %v378_v37 = vmul.f32 %v988_v52, %v377_v35  ;;  %v380_v38 = vstv %s1035_s0  ;;  %v325_v52 = vadd.f32 %v324_v45, %v321_v24  ;;  %v370_v56 = vadd.f32 %v369_v49, %v366_v43  ;;  %s531_s24 = sld [smem:[#allocation2 + $0x492]] (%p85_p11)  ;;  %s535_s22 = sld [smem:[#allocation2 + $0x493]] (%p85_p11) }
  0x8e   : > { %v383_v39 = vstv %s1040_s12  ;;  %v344_v4 = vmul.f32 %v343_v42, %v341_v62  ;;  %s532_s14 = sld [smem:[#allocation6 + $0x492]] (%p85_p11)  ;;  %s1082_s23 = sld [smem:[#allocation6 + $0x493]] (%p85_p11) }
  0x8f   : > { %v358_v48 = vstv %s1045_s2  ;;  %v381_v50 = vadd.f32 %v380_v38, %v378_v37  ;;  %v384_v51 = vmul.f32 %v383_v39, %v295_v36  ;;  %v326_v61 = vmax.f32 %v325_v52, 0.0  ;;  %s533_s7 = sld [smem:[#allocation4 + $0x492]] (%p85_p11)  ;;  %s537_s21 = sld [smem:[#allocation4 + $0x493]] (%p85_p11) }
  0x90   : > { %v373_v57 = vstv %s1053_s18  ;;  %v371_v0 = vmax.f32 %v370_v56, 0.0  ;;  %v359_v5 = vmul.f32 %v358_v48, %v356_v63  ;;  %s1084_s25 = sld [smem:[#allocation7 + $0x492]] (%p85_p11)  ;;  %s539_s1 = sld [smem:[#allocation2 + $0x494]] (%p85_p11) }
  0x91   : > { %v385_v58 = vadd.f32 %v384_v51, %v381_v50  ;;  %v388_v59 = vstv %s1055_s19  ;;  %v329_v3 = vmul.f32 %v328_v41, %v326_v61  ;;  %s1089_s3 = sld [smem:[#allocation6 + $0x494]] (%p85_p11)  ;;  %s1091_s8 = sld [smem:[#allocation7 + $0x493]] (%p85_p11) }
  0x92   : > { %v374_v6 = vmul.f32 %v373_v57, %v371_v0  ;;  %v391_v9 = vadd.f32 %v359_v5, %v344_v4  ;;  %v394_v10 = vstv %s393_s20  ;;  %s541_s4 = sld [smem:[#allocation4 + $0x494]] (%p85_p11)  ;;  %s1093_s26 = sld [smem:[#allocation2 + $0x495]] (%p85_p11) }
  0x93   : > { %v386_v1 = vmax.f32 %v385_v58, 0.0  ;;  %v390_v8 = vadd.f32 %v329_v3, %v314_v2  ;;  %v402_v17 = vstv (%p85_p11), %s531_s24  ;;  %s1095_s29 = sld [smem:[#allocation6 + $0x495]] (%p85_p11)  ;;  %s1097_s9 = sld [smem:[#allocation7 + $0x494]] (%p85_p11)  ;;  %v416_v22 = vstv (%p85_p11), %s535_s22 }
  0x94   :  { %v405_v18 = vstv (%p85_p11), %s532_s14  ;;  %v403_v19 = vmul.f32 (%p85_p11), %v530_v16, %v402_v17  ;;  %s1099_s10 = sld [smem:[#allocation4 + $0x495]] (%p85_p11)  ;;  %v419_v23 = vstv (%p85_p11), %s1082_s23  ;;  %s1103_s5 = sld [smem:[#allocation2 + $0x496]] (%p85_p11)  ;;  %v417_v25 = vmul.f32 (%p85_p11), %v530_v16, %v416_v22 }
  0x95   : > { %v389_v7 = vmul.f32 %v388_v59, %v386_v1  ;;  %v396_v12 = vadd.f32 %v391_v9, %v390_v8  ;;  %v408_v20 = vstv (%p85_p11), %s533_s7  ;;  %s1105_s30 = sld [smem:[#allocation6 + $0x496]] (%p85_p11)  ;;  %v422_v26 = vstv (%p85_p11), %s537_s21  ;;  %s1107_s11 = sld [smem:[#allocation7 + $0x495]] (%p85_p11) }
  0x96   :  { %v406_v24 = vadd.f32 (%p85_p11), %v405_v18, %v403_v19  ;;  %s1109_s13 = sld [smem:[#allocation4 + $0x496]] (%p85_p11)  ;;  %v430_v28 = vstv (%p85_p11), %s539_s1  ;;  %s1113_s15 = sld [smem:[#allocation2 + $0x497]] (%p85_p11)  ;;  %v420_v31 = vadd.f32 (%p85_p11), %v419_v23, %v417_v25  ;;  %v413_v37 = vstv (%p85_p11), %s1084_s25 }
  0x97   : > { %v392_v11 = vadd.f32 %v389_v7, %v374_v6  ;;  %v433_v29 = vstv (%p85_p11), %s1089_s3  ;;  %s1115_s16 = sld [smem:[#allocation6 + $0x497]] (%p85_p11)  ;;  %v431_v32 = vmul.f32 (%p85_p11), %v530_v16, %v430_v28  ;;  %s1123_s0 = sld [smem:[#allocation7 + $0x496]] (%p85_p11)  ;;  %v427_v42 = vstv (%p85_p11), %s1091_s8 }
  0x98   :  { %v436_v33 = vstv (%p85_p11), %s541_s4  ;;  %s1117_s17 = sld [smem:[#allocation4 + $0x497]] (%p85_p11)  ;;  %v444_v35 = vstv (%p85_p11), %s1093_s26  ;;  %s555_s2 = sld [smem:[#allocation9 + $0xc3]] (%p85_p11) }
  0x99   : > { %v395_v13 = vadd.f32 %v394_v10, %v392_v11  ;;  %v447_v36 = vstv (%p85_p11), %s1095_s29  ;;  %v434_v39 = vadd.f32 (%p85_p11), %v433_v29, %v431_v32  ;;  %v445_v40 = vmul.f32 (%p85_p11), %v530_v16, %v444_v35  ;;  %s1129_s12 = sld [smem:[#allocation7 + $0x497]] (%p85_p11) }
  0x9a   :  { %87 = sbr.rel (!%p85_p11) target bundleno = 62 (0x3e), region = 75  ;;  %v450_v43 = vstv (%p85_p11), %s1099_s10  ;;  %v458_v44 = vstv (%p85_p11), %s1103_s5  ;;  %v441_v49 = vstv (%p85_p11), %s1097_s9 }
  0x9b   : > { %v397_v14 = vadd.f32 %v396_v12, %v395_v13  ;;  %v448_v47 = vadd.f32 (%p85_p11), %v447_v36, %v445_v40  ;;  %v461_v48 = vstv (%p85_p11), %s1105_s30  ;;  %v459_v51 = vmul.f32 (%p85_p11), %v530_v16, %v458_v44 }
  0x9c   :  { %v464_v53 = vstv (%p85_p11), %s1109_s13  ;;  %v455_v54 = vstv (%p85_p11), %s1107_s11  ;;  %v472_v56 = vstv (%p85_p11), %s1113_s15 }
  0x9d   : > { %v1074_v0 = vmax.f32 %v397_v14, 0.0   ;;  %v462_v58 = vadd.f32 (%p85_p11), %v461_v48, %v459_v51  ;;  %v473_v59 = vmul.f32 (%p85_p11), %v530_v16, %v472_v56  ;;  %v475_v60 = vstv (%p85_p11), %s1115_s16 }
  0x9e   :  { %v469_v5 = vstv (%p85_p11), %s1123_s0  ;;  %v489_v16 = vstv (%p85_p11), %s555_s2 }
  0x9f   : > { %v1152_v15 = vmov %v1074_v0  ;;  %v476_v3 = vadd.f32 (%p85_p11), %v475_v60, %v473_v59  ;;  %v483_v9 = vstv (%p85_p11), %s1129_s12 }
  0xa0   : > { %v1153_v0 = vmov %v1152_v15  ;;  %v409_v21 = vmul.f32 (%p85_p11), %v408_v20, %v1152_v15  ;;  %v423_v27 = vmul.f32 (%p85_p11), %v422_v26, %v1152_v15  ;;  %v437_v34 = vmul.f32 (%p85_p11), %v436_v33, %v1152_v15 }
  0xa1   :  { %v451_v50 = vmul.f32 %v450_v43, %v1152_v15  ;;  %v465_v55 = vmul.f32 %v464_v53, %v1152_v15  ;;  %v478_v0 = vstv %s1117_s17 }
  0xa2   :  { %v410_v30 = vadd.f32 %v409_v21, %v406_v24  ;;  %v424_v38 = vadd.f32 %v423_v27, %v420_v31  ;;  %v438_v46 = vadd.f32 %v437_v34, %v434_v39  ;;  %v479_v4 = vmul.f32 %v478_v0, %v1152_v15 }
  0xa3   :  { %v452_v57 = vadd.f32 %v451_v50, %v448_v47  ;;  %v466_v2 = vadd.f32 %v465_v55, %v462_v58 }
  0xa4   :  { %v411_v41 = vmax.f32 %v410_v30, 0.0  ;;  %v425_v45 = vmax.f32 %v424_v38, 0.0  ;;  %v439_v52 = vmax.f32 %v438_v46, 0.0  ;;  %v480_v8 = vadd.f32 %v479_v4, %v476_v3 }
  0xa5   :  { %v453_v1 = vmax.f32 %v452_v57, 0.0  ;;  %v467_v7 = vmax.f32 %v466_v2, 0.0 }
  0xa6   :  { %v414_v61 = vmul.f32 %v413_v37, %v411_v41  ;;  %v428_v62 = vmul.f32 %v427_v42, %v425_v45  ;;  %v442_v63 = vmul.f32 %v441_v49, %v439_v52  ;;  %v481_v11 = vmax.f32 %v480_v8, 0.0 }
  0xa7   :  { %v456_v6 = vmul.f32 %v455_v54, %v453_v1  ;;  %v470_v10 = vmul.f32 %v469_v5, %v467_v7 }
  0xa8   :  { %v485_v12 = vadd.f32 %v428_v62, %v414_v61  ;;  %v484_v14 = vmul.f32 %v483_v9, %v481_v11 }
  0xa9   :  { %v486_v13 = vadd.f32 %v456_v6, %v442_v63 }
  0xaa   :  { %v487_v17 = vadd.f32 %v484_v14, %v470_v10 }
  0xab   :  { %v491_v18 = vadd.f32 %v486_v13, %v485_v12 }
  0xac   :  { %v490_v19 = vadd.f32 %v489_v16, %v487_v17 }
  0xae   :  { %v492_v20 = vadd.f32 %v491_v18, %v490_v19 }
  0xb0   :  { %v556_v21 = vmul.f32 -1.442695, %v492_v20 }
  0xb2   :  { %578 = vpow2.f32 %v556_v21 }
  0xbc   :  { %v579_v22 = vpop.eup %578 }
  0xbd   :  { %v496_v23 = vadd.f32 1.0, %v579_v22 }
  0xbf   :  { %580 = vrcp.f32 %v496_v23 }
  0xc9   :  { %v581_v15 = vpop.eup %580 }
  0xca   :  { %499 = vst [vmem:[%s1151_s6] sm:$0xff] %v581_v15 }
  0xcb   :  { %504 = vsyncpa [#allocation3], 1 }
  0xcc   :  { %505 = vsyncpa [#allocation5], 1 }
  0xcd   :  { %506 = vsyncpa [#allocation8], 1 }

</bundles_post_ra>
